<compile_context>
chip_gen: v5e
topology: v5e:2x2
jax: 0.10.0
libtpu: 0.0.40
codegen_flags: <defaults>
</compile_context>

<pallas_src>
import functools

import jax
import jax.numpy as jnp
from jax.experimental import pallas as pl
from jax.experimental.pallas import tpu as pltpu


# ---------------------------------------------------------------------------
# Kernel: one MXU matmul tile with the bias add fused into the epilogue
# ---------------------------------------------------------------------------
def _dense_kernel(x_ref, w_ref, b_ref, o_ref):
    # x_ref: (bm, K) bf16   w_ref: (K, N) bf16   b_ref: (1, N) f32
    acc = jnp.dot(x_ref[...], w_ref[...], preferred_element_type=jnp.float32)
    o_ref[...] = (acc + b_ref[...]).astype(o_ref.dtype)


def _choose_bm(M):
    """Pick an M tile that divides M exactly (avoids wrapper pad/slice copies).

    Small M -> one full block.  Large M -> 256-row tiles (native v6e/v7x MXU
    shape); fall back to 128/64/... if 256 does not divide M.
    """
    if M <= 256:
        return M
    for bm in (256, 128, 64, 32, 16, 8):
        if M % bm == 0:
            return bm
    return None


# ---------------------------------------------------------------------------
# Wrapper: PyTorch Dense forward  ->  (x @ W.T + b)[..., None, None]
# ---------------------------------------------------------------------------
def pallas_dense(x, weight, bias=None, *, out_dtype=jnp.float32):
    """x: (..., K) float; weight: (N, K) [PyTorch nn.Linear layout]; bias: (N,).

    Returns (..., N, 1, 1) in `out_dtype`.
    """
    *lead, K = x.shape
    N, K2 = weight.shape
    assert K == K2, (K, K2)

    M = 1
    for d in lead:
        M *= d
    if M == 0:
        return jnp.zeros((*lead, N, 1, 1), out_dtype)

    a = x.reshape(M, K).astype(jnp.bfloat16)          # (M, K) bf16 for the MXU
    b = weight.T.astype(jnp.bfloat16)                 # (K, N)
    if bias is None:
        bias = jnp.zeros((N,), jnp.float32)
    bias2d = bias.astype(jnp.float32).reshape(1, N)

    bm = _choose_bm(M)
    Mp = M
    if bm is None:
        # TODO(synk): mask the tail rows in-kernel instead of this rare pad path.
        bm = 128
        Mp = -(-M // bm) * bm
        a = jnp.pad(a, ((0, Mp - M), (0, 0)))

    out = pl.pallas_call(
        _dense_kernel,
        out_shape=jax.ShapeDtypeStruct((Mp, N), out_dtype),
        grid=(Mp // bm,),
        in_specs=[
            pl.BlockSpec((bm, K), lambda i: (i, 0)),   # M-tiled activations
            pl.BlockSpec((K, N), lambda i: (0, 0)),    # full weight, resident
            pl.BlockSpec((1, N), lambda i: (0, 0)),    # bias row, resident
        ],
        out_specs=pl.BlockSpec((bm, N), lambda i: (i, 0)),
        compiler_params=pltpu.CompilerParams(
            dimension_semantics=("parallel",)),
    )(a, b, bias2d)

    if Mp != M:
        out = out[:M]
    # `[..., None, None]` from the PyTorch module: metadata-only reshape.
    return out.reshape(*lead, N, 1, 1)


if __name__ == "__main__":
    key = jax.random.PRNGKey(0)
    kx, kw, kb, kx2, kw2 = jax.random.split(key, 5)

    # --- small shapes matching the module (Dense(input_dim, output_dim)) ---
    batch, input_dim, output_dim = 2, 32, 16
    x = jax.random.normal(kx, (batch, input_dim), jnp.float32)
    weight = (jax.random.normal(kw, (output_dim, input_dim), jnp.float32)
              / jnp.sqrt(input_dim))
    bias = jax.random.normal(kb, (output_dim,), jnp.float32) * 0.1

    dense = jax.jit(pallas_dense)
    out = jax.block_until_ready(dense(x, weight, bias))

    assert out.shape == (batch, output_dim, 1, 1), out.shape
    assert jnp.all(jnp.isfinite(out))
    ref = (x @ weight.T + bias)[..., None, None]
    assert jnp.allclose(out, ref, rtol=2e-2, atol=2e-2), \
        float(jnp.max(jnp.abs(out - ref)))

    # --- larger batch to exercise the tiled ("parallel") multi-block path ---
    M2, K2d, N2 = 512, 256, 128
    x2 = jax.random.normal(kx2, (M2, K2d), jnp.float32)
    w2 = jax.random.normal(kw2, (N2, K2d), jnp.float32) / jnp.sqrt(K2d)
    out2 = jax.block_until_ready(dense(x2, w2, None))
    assert out2.shape == (M2, N2, 1, 1), out2.shape
    ref2 = (x2 @ w2.T)[..., None, None]
    assert jnp.allclose(out2, ref2, rtol=2e-2, atol=2e-2), \
        float(jnp.max(jnp.abs(out2 - ref2)))

    print("KERNEL_OK")
</pallas_src>

<mosaic_0001>
module attributes {stable_mosaic.version = 11 : i64} {
  func.func @_dense_kernel(%arg0: i32, %arg1: memref<2x32xbf16, #tpu.memory_space<vmem>>, %arg2: memref<32x16xbf16, #tpu.memory_space<vmem>>, %arg3: memref<1x16xf32, #tpu.memory_space<vmem>>, %arg4: memref<2x16xf32, #tpu.memory_space<vmem>>) attributes {dimension_semantics = [#tpu.dimension_semantics<parallel>], iteration_bounds = array<i64: 1>, scalar_prefetch = 0 : i64, scratch_operands = 0 : i64, tpu.core_type = #tpu.core_type<tc>, window_params = [{transform_indices = @transform_0, window_bounds = array<i64: 2, 32>}, {pipeline_mode = #tpu.pipeline_mode<synchronous>, transform_indices = @transform_1, window_bounds = array<i64: 32, 16>}, {pipeline_mode = #tpu.pipeline_mode<synchronous>, transform_indices = @transform_2, window_bounds = array<i64: 1, 16>}, {transform_indices = @transform_3, window_bounds = array<i64: 2, 16>}]} {
    %c0 = arith.constant 0 : index
    %c0_0 = arith.constant 0 : index
    %0 = vector.load %arg1[%c0, %c0_0] : memref<2x32xbf16, #tpu.memory_space<vmem>>, vector<2x32xbf16>
    %c0_1 = arith.constant 0 : index
    %c0_2 = arith.constant 0 : index
    %1 = vector.load %arg2[%c0_1, %c0_2] : memref<32x16xbf16, #tpu.memory_space<vmem>>, vector<32x16xbf16>
    %cst = arith.constant dense<0.000000e+00> : vector<2x16xf32>
    %2 = tpu.matmul %0, %1, %cst {dimension_numbers = #tpu.dot_dimension_numbers<[1], [0], [0], [1], [0, 0, 1, 1], [], []>} : vector<2x32xbf16>, vector<32x16xbf16>, vector<2x16xf32> -> vector<2x16xf32>
    %c0_3 = arith.constant 0 : index
    %c0_4 = arith.constant 0 : index
    %3 = vector.load %arg3[%c0_3, %c0_4] : memref<1x16xf32, #tpu.memory_space<vmem>>, vector<1x16xf32>
    %4 = vector.broadcast %3 : vector<1x16xf32> to vector<2x16xf32>
    %5 = arith.addf %2, %4 : vector<2x16xf32>
    %c0_5 = arith.constant 0 : index
    %c0_6 = arith.constant 0 : index
    %6 = vector.load %arg4[%c0_5, %c0_6] : memref<2x16xf32, #tpu.memory_space<vmem>>, vector<2x16xf32>
    tpu.vector_store %arg4[%c0_5, %c0_6], %5 {strides = array<i32>} : memref<2x16xf32, #tpu.memory_space<vmem>>, vector<2x16xf32>,
    return
  }
  func.func @transform_0(%arg0: i32) -> (i32, i32) {
    %c0_i32 = arith.constant 0 : i32
    %c0_i32_0 = arith.constant 0 : i32
    return %arg0, %c0_i32 : i32, i32
  }
  func.func @transform_1(%arg0: i32) -> (i32, i32) {
    %c0_i32 = arith.constant 0 : i32
    %c0_i32_0 = arith.constant 0 : i32
    %c0_i32_1 = arith.constant 0 : i32
    return %c0_i32, %c0_i32_0 : i32, i32
  }
  func.func @transform_2(%arg0: i32) -> (i32, i32) {
    %c0_i32 = arith.constant 0 : i32
    %c0_i32_0 = arith.constant 0 : i32
    %c0_i32_1 = arith.constant 0 : i32
    return %c0_i32, %c0_i32_0 : i32, i32
  }
  func.func @transform_3(%arg0: i32) -> (i32, i32) {
    %c0_i32 = arith.constant 0 : i32
    %c0_i32_0 = arith.constant 0 : i32
    return %arg0, %c0_i32 : i32, i32
  }
}

</mosaic_0001>

<bundles_post_ra>
// kernel: pallas_dense.1
= control target key start
LH: loop header
LB: loop body
LE: loop exit
PB: predicated region body
PF: predicated region fallthrough
CT: control target
= control target key end

     0   :  { %s147_s0 = inlined_call_operand.vmem [shape: bf16[2,32], index: 0, kind: input, shape index: {}]   ;;  %s148_s1 = inlined_call_operand.vmem [shape: bf16[32,16], index: 1, kind: input, shape index: {}]   ;;  %s149_s2 = inlined_call_operand.vmem [shape: f32[1,16], index: 2, kind: input, shape index: {}]   ;;  %s150_s3 = inlined_call_operand.hbm [shape: f32[2,16], index: 3, kind: output, shape index: {}]  }
   0x1   :  { %v82_v0 = vld [vmem:[%s148_s1 + $0x8] sm:$0xff] }
   0x2   :  { %8 = vsyncpa [#allocation3], 0  ;;  %47 = vmatpush.bf16.msra.mxu0 %v82_v0  ;;  %v81_v1 = vld [vmem:[%s148_s1] sm:$0xff]  ;;  %vm37_vm0 = vcmask 261120   ;;  %s111_s20 = smov [#allocation2]   ;;  %s63_s24 = sshll.u32 %s150_s3, 4  ;;  %s64_s24 = int_to_ptr.hbm [resolvable:$true] %s63_s24 }
   0x3   :  { %v16_v2 = vld [vmem:[%s147_s0] sm:$0x1]  ;;  %s61_s21 = sshll.u32 %s111_s20, 4  ;;  %vm54_vm1 = vcmask 123904   ;;  %s62_s21 = int_to_ptr.vmem [resolvable:$true] %s61_s21 }
   0x4   :  { %v84_v3 = vld [vmem:[%s149_s2] ss:$0 sm:$0xff] }
   0x6   :  { %48 = vmatpush.bf16.msra.mxu0 %v81_v1 }
   0x9   :  { %80 = vmatmul.msk.bf16.vlgmr.msra.gmra.mxu0 %vm37_vm0, %v16_v2 }
  0x86   :  { %v50_v4 = vpop.f32.mrf.mxu0 }
  0x87   :  { %v51_v5 = vadd.f32 %v84_v3, %v50_v4 }
  0x89   :  { %55 = vst.msk [vmem:[#allocation2] sm:$0x3] %vm54_vm1, %v51_v5 }
  0x8a   :  { %66 = dma.vmem_to_hbm [thread:$0]  %s62_s21, 32, %s64_s24, [#allocation3]  }
  0x8e   :  { %v52_v6 = vpop.f32.mrf.mxu0 }
  0x8f   :  { %109 = dma.done.wait [#allocation3], 32  }
  0x90   :  { %110 = vsyncadd [#allocation3], 4294967264 }
  0x91   :  { %71 = vsyncpa [#allocation3], 1 }

</bundles_post_ra>
